<compile_context>
chip_gen: v5e
topology: v5e:2x2
jax: 0.10.0
libtpu: 0.0.40
codegen_flags: <defaults>
</compile_context>

<pallas_src>
import jax
import jax.numpy as jnp
from jax import lax
from jax.experimental import pallas as pl
from jax.experimental.pallas import tpu as pltpu

EPS = 1e-5  # nn.BatchNorm1d default


# ---------------------------------------------------------------------------
# Kernels
# ---------------------------------------------------------------------------
def _bn_native_kernel(x_ref, gamma_ref, beta_ref, o_ref, sum_ref, sq_ref):
    """Native-layout kernel.  x_ref: (N, TC, L); stats over (N, L) per channel.

    Two row-wise passes over the VMEM-resident tile so the only full-width
    f32 state is the two (TC, L) accumulators; rows are upcast to f32 one at
    a time inside the loops.
    """
    n = x_ref.shape[0]
    l = x_ref.shape[2]

    sum_ref[...] = jnp.zeros_like(sum_ref)
    sq_ref[...] = jnp.zeros_like(sq_ref)

    # Pass 1: accumulate per-channel sum and sum-of-squares (f32).
    @pl.loop(0, n)
    def _(i):
        row = x_ref[i].astype(jnp.float32)            # (TC, L)
        sum_ref[...] += row
        sq_ref[...] += row * row

    inv_m = 1.0 / float(n * l)
    s = jnp.sum(sum_ref[...], axis=1, keepdims=True)  # (TC, 1) lane reduce
    s2 = jnp.sum(sq_ref[...], axis=1, keepdims=True)  # (TC, 1)
    mean = s * inv_m
    # Biased variance (torch training-mode BN).  f32 accumulation + clamp
    # guards the E[x^2] - mean^2 form against cancellation for typical data.
    var = jnp.maximum(s2 * inv_m - mean * mean, 0.0)
    inv_std = lax.rsqrt(var + EPS)

    scale = inv_std * gamma_ref[0]                    # (TC, 1)
    shift = beta_ref[0] - mean * scale                # (TC, 1)

    # Pass 2: fused normalize, one mul + one add per element.
    @pl.loop(0, n)
    def _(i):
        row = x_ref[i].astype(jnp.float32)
        o_ref[i] = (row * scale + shift).astype(o_ref.dtype)


def _bn_packed_kernel(x_ref, gamma_ref, beta_ref, o_ref):
    """Lane-dense kernel.  x_ref: (TC, M) with M = N*L on the lane axis."""
    x = x_ref[...].astype(jnp.float32)
    inv_m = 1.0 / float(x.shape[1])
    mean = jnp.sum(x, axis=1, keepdims=True) * inv_m                   # (TC, 1)
    var = jnp.maximum(jnp.sum(x * x, axis=1, keepdims=True) * inv_m
                      - mean * mean, 0.0)
    inv_std = lax.rsqrt(var + EPS)
    scale = inv_std * gamma_ref[...]                                   # (TC, 1)
    shift = beta_ref[...] - mean * scale
    o_ref[...] = (x * scale + shift).astype(o_ref.dtype)


# ---------------------------------------------------------------------------
# Tile-size / VMEM planning
# ---------------------------------------------------------------------------
def _sublane_multiple(dtype):
    # Rows per packed sublane group: f32 -> 8, bf16/f16 -> 16, int8/fp8 -> 32.
    return {4: 8, 2: 16, 1: 32}.get(jnp.dtype(dtype).itemsize, 8)


def _ceil_div(a, b):
    return -(-a // b)


def _round_up(v, m):
    return _ceil_div(v, m) * m


def _vmem_plan():
    """Returns (block_budget_bytes, vmem_limit_bytes), generation aware."""
    try:
        cap = int(pltpu.get_tpu_info().vmem_capacity_bytes)
        if cap <= 0:
            cap = 128 * 1024 * 1024
    except Exception:
        cap = 128 * 1024 * 1024
    if cap <= 64 * 1024 * 1024:
        # v7x-class: 64 MiB physical VMEM per TensorCore -> ~6-8 MiB blocks.
        limit = min(52 * 1024 * 1024, (3 * cap) // 4)
    else:
        # v5e / v6e: 128 MiB physical VMEM -> ~8-16 MiB blocks.
        limit = min(96 * 1024 * 1024, (3 * cap) // 4)
    budget = (2 * limit) // 3
    return budget, limit


def _choose_tc(C, per_channel_bytes, budget_bytes, mult):
    tc = max(1, int(budget_bytes) // max(int(per_channel_bytes), 1))
    if C >= 2 * mult:
        # Keep at least 2 channel tiles so the "parallel" grid axis can
        # load-balance across both TensorCores on v7x (free on v5e/v6e).
        tc = min(tc, _round_up(_ceil_div(C, 2), mult))
    if tc >= C:
        return C
    return min(C, max(mult, (tc // mult) * mult))


# ---------------------------------------------------------------------------
# Wrapper
# ---------------------------------------------------------------------------
def batch_norm_1d(x, gamma, beta, *, repack=None, channels_per_block=None):
    """BatchNorm1d forward with training-mode batch statistics.

    x: (N, C, L) or (N, C).  Returns the normalized output in x.dtype.
    repack: None -> auto (use lane-dense (C, N*L) layout when L < 128);
            True/False to force.
    channels_per_block: optional override of the channel-tile size (must be a
            multiple of the dtype's sublane packing, or cover all channels).
    """
    squeeze = x.ndim == 2
    if squeeze:
        x = x[:, :, None]
    N, C, L = x.shape
    itemsize = jnp.dtype(x.dtype).itemsize
    mult = _sublane_multiple(x.dtype)
    budget, limit = _vmem_plan()
    if repack is None:
        repack = L < 128  # native layout would be lane-sparse

    gamma = gamma.astype(jnp.float32)
    beta = beta.astype(jnp.float32)
    cparams = pltpu.CompilerParams(
        dimension_semantics=("parallel",),  # channel tiles across TensorCores
        vmem_limit_bytes=limit,
    )

    if repack:
        # Lane-dense layout (C, N*L): one XLA transpose each way, accepted
        # only when L is small enough that native-layout stores/DMAs would be
        # badly lane-sparse.
        M = N * L
        xt = jnp.transpose(x, (1, 0, 2)).reshape(C, M)
        # This body materializes ~3 f32 copies of its tile; size TC for it,
        # on top of the double-buffered native-dtype in/out blocks.
        per_ch = 4 * M * itemsize + 12 * M
        TC = channels_per_block or _choose_tc(C, per_ch, budget, mult)
        grid = (pl.cdiv(C, TC),)
        yt = pl.pallas_call(
            _bn_packed_kernel,
            out_shape=jax.ShapeDtypeStruct((C, M), x.dtype),
            grid=grid,
            in_specs=[
                pl.BlockSpec((TC, M), lambda i: (i, 0)),
                pl.BlockSpec((TC, 1), lambda i: (i, 0)),
                pl.BlockSpec((TC, 1), lambda i: (i, 0)),
            ],
            out_specs=pl.BlockSpec((TC, M), lambda i: (i, 0)),
            compiler_params=cparams,
        )(xt, gamma.reshape(C, 1), beta.reshape(C, 1))
        out = jnp.transpose(yt.reshape(C, N, L), (1, 0, 2))
    else:
        # Native (N, C, L) layout: single HBM read + single write, no host
        # transposes.  VMEM per channel: double-buffered in + out blocks
        # (native dtype) + two (TC, L) f32 accumulators + one f32 row temp.
        per_ch = 4 * N * L * itemsize + 12 * L
        TC = channels_per_block or _choose_tc(C, per_ch, budget, mult)
        grid = (pl.cdiv(C, TC),)
        # TODO(synk): if N*L is so large that even a sublane-multiple channel
        # tile exceeds the VMEM budget, add a second "arbitrary" grid axis
        # over N with sum/sumsq carried in scratch (2 HBM reads + 1 write).
        out = pl.pallas_call(
            _bn_native_kernel,
            out_shape=jax.ShapeDtypeStruct((N, C, L), x.dtype),
            grid=grid,
            in_specs=[
                pl.BlockSpec((N, TC, L), lambda i: (0, i, 0)),
                pl.BlockSpec((1, TC, 1), lambda i: (0, i, 0)),
                pl.BlockSpec((1, TC, 1), lambda i: (0, i, 0)),
            ],
            out_specs=pl.BlockSpec((N, TC, L), lambda i: (0, i, 0)),
            scratch_shapes=[
                pltpu.VMEM((TC, L), jnp.float32),  # sum
                pltpu.VMEM((TC, L), jnp.float32),  # sum of squares
            ],
            compiler_params=cparams,
        )(x, gamma.reshape(1, C, 1), beta.reshape(1, C, 1))

    if squeeze:
        out = out[:, :, 0]
    return out


def batch_norm_1d_ref(x, gamma, beta):
    # Pure-JAX reference (training-mode batch stats, biased variance).
    mean = jnp.mean(x, axis=(0, 2), keepdims=True)
    var = jnp.mean((x - mean) ** 2, axis=(0, 2), keepdims=True)
    return ((x - mean) / jnp.sqrt(var + EPS) * gamma.reshape(1, -1, 1)
            + beta.reshape(1, -1, 1))


if __name__ == "__main__":
    key = jax.random.PRNGKey(0)

    # --- Test A: module-shaped input, nn.BatchNorm1d default params --------
    N, C, L = 2, 4, 16
    x = jax.random.normal(key, (N, C, L), dtype=jnp.float32)
    gamma = jnp.ones((C,), dtype=jnp.float32)   # weight default
    beta = jnp.zeros((C,), dtype=jnp.float32)   # bias default

    out = jax.block_until_ready(batch_norm_1d(x, gamma, beta))  # auto: packed
    ref = batch_norm_1d_ref(x, gamma, beta)
    assert out.shape == (N, C, L)
    assert jnp.allclose(out, ref, atol=1e-5, rtol=1e-5)

    # --- Test B: native-layout path, auto tiling (>=2 channel tiles) -------
    N2, C2, L2 = 2, 24, 128
    x2 = jax.random.normal(jax.random.PRNGKey(0), (N2, C2, L2), dtype=jnp.float32)
    g2 = jnp.linspace(0.5, 1.5, C2, dtype=jnp.float32)
    b2 = jnp.linspace(-0.3, 0.3, C2, dtype=jnp.float32)
    ref2 = batch_norm_1d_ref(x2, g2, b2)

    out2 = jax.block_until_ready(batch_norm_1d(x2, g2, b2, repack=False))
    assert jnp.allclose(out2, ref2, atol=1e-4, rtol=1e-4)

    # --- Test C: native-layout path, explicit multi-tile channel grid ------
    out3 = jax.block_until_ready(
        batch_norm_1d(x2, g2, b2, repack=False, channels_per_block=8))
    assert jnp.allclose(out3, ref2, atol=1e-4, rtol=1e-4)

    print("KERNEL_OK")
</pallas_src>

<mosaic_0001>
module attributes {stable_mosaic.version = 11 : i64} {
  func.func @_bn_packed_kernel(%arg0: i32, %arg1: memref<4x32xf32, #tpu.memory_space<vmem>>, %arg2: memref<4x1xf32, #tpu.memory_space<vmem>>, %arg3: memref<4x1xf32, #tpu.memory_space<vmem>>, %arg4: memref<4x32xf32, #tpu.memory_space<vmem>>) attributes {dimension_semantics = [#tpu.dimension_semantics<parallel>], iteration_bounds = array<i64: 1>, scalar_prefetch = 0 : i64, scratch_operands = 0 : i64, tpu.core_type = #tpu.core_type<tc>, window_params = [{transform_indices = @transform_0, window_bounds = array<i64: 4, 32>}, {transform_indices = @transform_1, window_bounds = array<i64: 4, 1>}, {transform_indices = @transform_2, window_bounds = array<i64: 4, 1>}, {transform_indices = @transform_3, window_bounds = array<i64: 4, 32>}]} {
    %c0 = arith.constant 0 : index
    %c0_0 = arith.constant 0 : index
    %0 = vector.load %arg1[%c0, %c0_0] : memref<4x32xf32, #tpu.memory_space<vmem>>, vector<4x32xf32>
    %cst = arith.constant dense<0.000000e+00> : vector<4xf32>
    %1 = vector.multi_reduction <add>, %0, %cst [1] : vector<4x32xf32> to vector<4xf32>
    %2 = vector.shape_cast %1 : vector<4xf32> to vector<4x1xf32>
    %cst_1 = arith.constant 3.125000e-02 : f32
    %3 = vector.broadcast %cst_1 : f32 to vector<4x1xf32>
    %4 = arith.mulf %2, %3 : vector<4x1xf32>
    %5 = arith.mulf %0, %0 : vector<4x32xf32>
    %cst_2 = arith.constant dense<0.000000e+00> : vector<4xf32>
    %6 = vector.multi_reduction <add>, %5, %cst_2 [1] : vector<4x32xf32> to vector<4xf32>
    %7 = vector.shape_cast %6 : vector<4xf32> to vector<4x1xf32>
    %cst_3 = arith.constant 3.125000e-02 : f32
    %8 = vector.broadcast %cst_3 : f32 to vector<4x1xf32>
    %9 = arith.mulf %7, %8 : vector<4x1xf32>
    %10 = arith.mulf %4, %4 : vector<4x1xf32>
    %11 = arith.subf %9, %10 : vector<4x1xf32>
    %cst_4 = arith.constant 0.000000e+00 : f32
    %12 = vector.broadcast %cst_4 : f32 to vector<4x1xf32>
    %13 = arith.maximumf %11, %12 : vector<4x1xf32>
    %cst_5 = arith.constant 9.99999974E-6 : f32
    %14 = vector.broadcast %cst_5 : f32 to vector<4x1xf32>
    %15 = arith.addf %13, %14 : vector<4x1xf32>
    %16 = math.rsqrt %15 : vector<4x1xf32>
    %c0_6 = arith.constant 0 : index
    %c0_7 = arith.constant 0 : index
    %17 = vector.load %arg2[%c0_6, %c0_7] : memref<4x1xf32, #tpu.memory_space<vmem>>, vector<4x1xf32>
    %18 = arith.mulf %16, %17 : vector<4x1xf32>
    %c0_8 = arith.constant 0 : index
    %c0_9 = arith.constant 0 : index
    %19 = vector.load %arg3[%c0_8, %c0_9] : memref<4x1xf32, #tpu.memory_space<vmem>>, vector<4x1xf32>
    %20 = arith.mulf %4, %18 : vector<4x1xf32>
    %21 = arith.subf %19, %20 : vector<4x1xf32>
    %22 = vector.broadcast %18 : vector<4x1xf32> to vector<4x32xf32>
    %23 = arith.mulf %0, %22 : vector<4x32xf32>
    %24 = vector.broadcast %21 : vector<4x1xf32> to vector<4x32xf32>
    %25 = arith.addf %23, %24 : vector<4x32xf32>
    %c0_10 = arith.constant 0 : index
    %c0_11 = arith.constant 0 : index
    %26 = vector.load %arg4[%c0_10, %c0_11] : memref<4x32xf32, #tpu.memory_space<vmem>>, vector<4x32xf32>
    tpu.vector_store %arg4[%c0_10, %c0_11], %25 {strides = array<i32>} : memref<4x32xf32, #tpu.memory_space<vmem>>, vector<4x32xf32>,
    return
  }
  func.func @transform_0(%arg0: i32) -> (i32, i32) {
    %c0_i32 = arith.constant 0 : i32
    %c0_i32_0 = arith.constant 0 : i32
    return %arg0, %c0_i32 : i32, i32
  }
  func.func @transform_1(%arg0: i32) -> (i32, i32) {
    %c0_i32 = arith.constant 0 : i32
    %c0_i32_0 = arith.constant 0 : i32
    return %arg0, %c0_i32 : i32, i32
  }
  func.func @transform_2(%arg0: i32) -> (i32, i32) {
    %c0_i32 = arith.constant 0 : i32
    %c0_i32_0 = arith.constant 0 : i32
    return %arg0, %c0_i32 : i32, i32
  }
  func.func @transform_3(%arg0: i32) -> (i32, i32) {
    %c0_i32 = arith.constant 0 : i32
    %c0_i32_0 = arith.constant 0 : i32
    return %arg0, %c0_i32 : i32, i32
  }
}

</mosaic_0001>

<bundles_post_ra>
// kernel: tpu_custom_call.1
= control target key start
LH: loop header
LB: loop body
LE: loop exit
PB: predicated region body
PF: predicated region fallthrough
CT: control target
= control target key end

     0   :  { %vm16_vm0 = vcmask 257024   ;;  %s143_s0 = inlined_call_operand.vmem [shape: f32[4,32], index: 0, kind: input, shape index: {}]   ;;  %s144_s1 = inlined_call_operand.vmem [shape: f32[4,1], index: 1, kind: input, shape index: {}]   ;;  %s145_s2 = inlined_call_operand.vmem [shape: f32[4,1], index: 2, kind: input, shape index: {}]   ;;  %s146_s3 = inlined_call_operand.hbm [shape: f32[4,32], index: 3, kind: output, shape index: {}]  }
   0x1   :  { %v15_v0 = vld [vmem:[%s143_s0] sm:$0xf] }
   0x2   :  { %8 = vsyncpa [#allocation3], 0  ;;  %v17_v1 = vsel %vm16_vm0, %v15_v0, 0.0  ;;  %v21_v2 = vmul.f32 %v15_v0, %v15_v0  ;;  %v106_v4 = vmov 0   ;;  %v40_v19 = vld [vmem:[%s144_s1] sm:$0xf] }
   0x3   :  { %18 = vadd.xlane.f32.xlu0 %v17_v1  ;;  %76 = vset.pattern.permute.xlu1 %v106_v4  ;;  %v42_v23 = vld [vmem:[%s145_s2] sm:$0xf]  ;;  %s107_s17 = smov [#allocation2]   ;;  %s65_s21 = sshll.u32 %s146_s3, 4  ;;  %s66_s21 = int_to_ptr.hbm [resolvable:$true] %s65_s21 }
   0x4   :  { %v22_v3 = vsel %vm16_vm0, %v21_v2, 0.0  ;;  %77 = vset.pattern.permute.xlu0 %v106_v4  ;;  %s63_s18 = sshll.u32 %s107_s17, 4  ;;  %s64_s18 = int_to_ptr.vmem [resolvable:$true] %s63_s18 }
   0xb   :  { %23 = vadd.xlane.f32.xlu0 %v22_v3 }
  0x76   :  { %v19_v5 = vpop.xlane.xlu0 %18 }
  0x77   :  { %v20_v6 = vmul.f32 0.03125, %v19_v5 }
  0x79   :  { %v26_v8 = vmul.f32 %v20_v6, %v20_v6 }
  0x7e   :  { %v24_v7 = vpop.xlane.xlu0 %23 }
  0x7f   :  { %v25_v9 = vmul.f32 0.03125, %v24_v7 }
  0x81   :  { %v27_v10 = vsub.f32 %v25_v9, %v26_v8 }
  0x83   :  { %v28_v11 = vmax.f32 %v27_v10, 0.0 }
  0x85   :  { %v29_v12 = vadd.f32 1e-05, %v28_v11 }
  0x87   :  { %78 = vrsqrt.f32 %v29_v12  ;;  %vm36_vm2 = vweird.f32 %v29_v12 }
  0x8d   :  { %v79_v13 = vpop.eup %78 }
  0x8e   :  { %v31_v14 = vmul.f32 %v79_v13, %v29_v12  ;;  %vm37_vm1 = vweird.f32 %v79_v13 }
  0x8f   :  { %vm38_vm3 = vmor %vm36_vm2, %vm37_vm1 }
  0x90   :  { %v32_v15 = vmul.f32 %v79_v13, %v31_v14 }
  0x92   :  { %v33_v16 = vmul.f32 0.5, %v32_v15 }
  0x94   :  { %v34_v17 = vsub.f32 1.5, %v33_v16 }
  0x96   :  { %v35_v18 = vmul.f32 %v79_v13, %v34_v17 }
  0x98   :  { %v39_v20 = vsel %vm38_vm3, %v79_v13, %v35_v18 }
  0x99   :  { %v41_v21 = vmul.f32 %v40_v19, %v39_v20 }
  0x9b   :  { %47 = vperm.xlu1 %76, %v41_v21   ;;  %v43_v22 = vmul.f32 %v41_v21, %v20_v6 }
  0x9d   :  { %v44_v24 = vsub.f32 %v42_v23, %v43_v22 }
  0xa3   :  { %53 = vperm.xlu1 %76, %v44_v24  }
 0x10d   :  { %v48_v25 = vpop.permute.xlu1 %47 }
 0x10e   :  { %v50_v26 = vmul.f32 %v48_v25, %v15_v0 }
 0x115   :  { %v54_v27 = vpop.permute.xlu1 %53 }
 0x116   :  { %v56_v28 = vadd.f32 %v54_v27, %v50_v26 }
 0x118   :  { %57 = vst.msk [vmem:[#allocation2] sm:$0xf] %vm16_vm0, %v56_v28 }
 0x119   :  { %68 = dma.vmem_to_hbm [thread:$0]  %s64_s18, 64, %s66_s21, [#allocation3]  }
 0x11a   :  { %104 = dma.done.wait [#allocation3], 64  }
 0x11b   :  { %105 = vsyncadd [#allocation3], 4294967232 }
 0x11c   :  { %73 = vsyncpa [#allocation3], 1 }

</bundles_post_ra>
